<compile_context>
chip_gen: v6e
topology: v6e:2x2x1
jax: 0.10.0
libtpu: 0.0.40
codegen_flags: <defaults>
</compile_context>

<pallas_src>
import numpy as np
import jax
import jax.numpy as jnp
from jax.experimental import pallas as pl
from jax.experimental.pallas import tpu as pltpu

_HALF_LOG_2PI = 0.5 * float(np.log(2.0 * np.pi))


def _logprob_kernel(t_ref, mu_ref, logsig_ref, out_ref, acc_ref):
    """Grid = (row_blocks, col_outer, col_inner); col_inner (last) is the reduction axis."""
    ji = pl.program_id(2)

    @pl.when(ji == 0)
    def _init():
        acc_ref[...] = jnp.zeros_like(acc_ref)

    td = t_ref.shape[1]
    acc_w = acc_ref.shape[1]          # 128 (lane width) when TD % 128 == 0, else TD
    n_chunks = td // acc_w            # static

    # Fold the (TB, TD) tile into a (TB, acc_w) value via lane-aligned column
    # slices (pure VPU adds; exp goes to the EUP slot), then a single RMW of
    # the narrow VMEM accumulator per grid step.
    col = None
    for k in range(n_chunks):
        lo = k * acc_w
        x = t_ref[:, lo:lo + acc_w].astype(jnp.float32) + 1e-8     # targets + 1e-08
        mu = mu_ref[:, lo:lo + acc_w].astype(jnp.float32)
        ls = logsig_ref[:, lo:lo + acc_w].astype(jnp.float32)
        # Normal log-prob with the constant -0.5*log(2*pi) hoisted to the wrapper:
        #   -0.5*((x-mu)/sigma)^2 - log(sigma)
        z = (x - mu) * jnp.exp(-ls)
        lp = -0.5 * (z * z) - ls
        col = lp if col is None else col + lp
    acc_ref[...] += col

    @pl.when(ji == pl.num_programs(2) - 1)
    def _finalize():
        # One small cross-lane/sublane reduce per output block, broadcast into
        # the lane-dense (1, 1, 8, 128) block (unmasked vector stores).
        tot = jnp.sum(acc_ref[...], axis=1, keepdims=True)   # lane reduce
        tot = jnp.sum(tot, axis=0, keepdims=True)            # sublane reduce
        out_ref[...] = jnp.broadcast_to(tot.reshape(1, 1, 1, 1), out_ref.shape)


def _pick_block(dim, target, align):
    """Largest block <= target that is a multiple of `align` and divides `dim`;
    falls back to the full dimension (full-extent blocks are always legal)."""
    if dim <= target:
        return dim
    best = None
    c = align
    while c <= target:
        if dim % c == 0:
            best = c
        c += align
    return best if best is not None else dim


def logprob_loss(targets, mu, log_sigma, data_shape, *, tb=512, td=2048):
    """Equivalent of LogProb(data_shape)(targets, Normal(mu, exp(log_sigma)))."""
    batch = targets.shape[0]
    # `targets.reshape(distribution.batch_shape)` + flatten(start_dim=1)
    t = targets.reshape(batch, -1)
    m = mu.reshape(batch, -1)
    s = log_sigma.reshape(batch, -1)
    D = t.shape[1]

    itemsizes = (t.dtype.itemsize, m.dtype.itemsize, s.dtype.itemsize)
    # Sublane alignment follows the packing of the narrowest input dtype
    # (8 rows per sublane tile for 4-byte, 16 for bf16, 32 for 1-byte types).
    sub_align = 8 * (4 // min(itemsizes))
    TB = _pick_block(batch, tb, sub_align)   # sublane axis (or full batch)
    TD = _pick_block(D, td, 128)             # lane axis: multiple of 128 or full D
    n_row = batch // TB
    n_col = D // TD

    # Megacore: guarantee >= 2 "parallel" blocks for small-batch shapes by
    # splitting the feature-block axis into an outer parallel dim (v7x has
    # 2 TensorCores; harmless no-op on v5e/v6e).
    if n_row == 1 and n_col >= 2 and n_col % 2 == 0:
        n_col_outer = 2
    else:
        n_col_outer = 1
    n_col_inner = n_col // n_col_outer

    acc_w = 128 if TD % 128 == 0 else TD

    in_spec = pl.BlockSpec((TB, TD), lambda i, jo, ji: (i, jo * n_col_inner + ji))

    cost = pl.CostEstimate(
        flops=8 * batch * D,
        transcendentals=batch * D,
        bytes_accessed=batch * D * sum(itemsizes) + n_row * n_col_outer * 8 * 128 * 4,
    )

    # 3 double-buffered input blocks + narrow accumulator + tiny output block;
    # request just enough scoped VMEM with headroom (v5e default is only 16 MiB).
    block_bytes = TB * TD * sum(itemsizes)
    vmem_est = 2 * block_bytes + TB * acc_w * 4 + 2 * 8 * 128 * 4
    vmem_limit = int(min(max(vmem_est + vmem_est // 4 + (2 << 20), 16 << 20), 56 << 20))

    partials = pl.pallas_call(
        _logprob_kernel,
        out_shape=jax.ShapeDtypeStruct((n_row, n_col_outer, 8, 128), jnp.float32),
        grid_spec=pltpu.PrefetchScalarGridSpec(
            num_scalar_prefetch=0,
            grid=(n_row, n_col_outer, n_col_inner),
            in_specs=[in_spec, in_spec, in_spec],
            out_specs=pl.BlockSpec((1, 1, 8, 128), lambda i, jo, ji: (i, jo, 0, 0)),
            scratch_shapes=[pltpu.VMEM((TB, acc_w), jnp.float32)],
        ),
        compiler_params=pltpu.CompilerParams(
            dimension_semantics=("parallel", "parallel", "arbitrary"),
            vmem_limit_bytes=vmem_limit,
        ),
        cost_estimate=cost,
    )(t, m, s)

    # Finish the reduction over partial blocks and re-add the hoisted constant.
    total = jnp.sum(partials[:, :, 0, 0]) - _HALF_LOG_2PI * (batch * D)
    scalar = batch * float(np.prod(data_shape)) * float(np.log(2.0))
    return total / scalar


def _reference(targets, mu, log_sigma, data_shape):
    batch = targets.shape[0]
    x = targets.reshape(batch, -1).astype(jnp.float32) + 1e-8
    m = mu.reshape(batch, -1).astype(jnp.float32)
    s = log_sigma.reshape(batch, -1).astype(jnp.float32)
    lp = -0.5 * ((x - m) * jnp.exp(-s)) ** 2 - s - 0.5 * jnp.log(2.0 * jnp.pi)
    per_example = jnp.sum(lp, axis=1)
    scalar = batch * float(np.prod(data_shape)) * float(np.log(2.0))
    return jnp.sum(per_example) / scalar


if __name__ == "__main__":
    key = jax.random.PRNGKey(0)
    k1, k2, k3 = jax.random.split(key, 3)

    data_shape = (4, 16, 16)                 # C, H, W  -> D = 1024
    B = 2
    targets = jax.random.uniform(k1, (B,) + data_shape, dtype=jnp.float32)
    mu = jax.random.normal(k2, (B,) + data_shape, dtype=jnp.float32) * 0.1
    log_sigma = jax.random.normal(k3, (B,) + data_shape, dtype=jnp.float32) * 0.1

    ref = jax.block_until_ready(_reference(targets, mu, log_sigma, data_shape))

    # Multi-tile path (grid = (1, 2, 2)): exercises the cross-step accumulator
    # and the 2-way parallel col_outer split (megacore path on v7x) ...
    loss_tiled = jax.block_until_ready(
        logprob_loss(targets, mu, log_sigma, data_shape, td=256))
    # ... and the default block size (grid = (1, 1, 1)) covers the single-tile
    # path with the 8-chunk in-register column fold.
    loss_full = jax.block_until_ready(
        logprob_loss(targets, mu, log_sigma, data_shape))

    assert jnp.allclose(loss_tiled, ref, rtol=1e-5, atol=1e-5), (loss_tiled, ref)
    assert jnp.allclose(loss_full, ref, rtol=1e-5, atol=1e-5), (loss_full, ref)

    # bf16 pass-through (kernel upcasts in-register; no wrapper-side cast pass).
    t_bf = targets.astype(jnp.bfloat16)
    m_bf = mu.astype(jnp.bfloat16)
    s_bf = log_sigma.astype(jnp.bfloat16)
    ref_bf = jax.block_until_ready(_reference(t_bf, m_bf, s_bf, data_shape))
    loss_bf = jax.block_until_ready(
        logprob_loss(t_bf, m_bf, s_bf, data_shape, td=512))
    assert jnp.allclose(loss_bf, ref_bf, rtol=1e-4, atol=1e-4), (loss_bf, ref_bf)

    # TODO(synk): `with_stats=True` MSE branch not implemented (default path only).
    print("KERNEL_OK")
</pallas_src>

<mosaic_0001>
module attributes {stable_mosaic.version = 11 : i64} {
  func.func @_logprob_kernel(%arg0: i32, %arg1: i32, %arg2: i32, %arg3: memref<2x256xf32, #tpu.memory_space<vmem>>, %arg4: memref<2x256xf32, #tpu.memory_space<vmem>>, %arg5: memref<2x256xf32, #tpu.memory_space<vmem>>, %arg6: memref<1x1x8x128xf32, #tpu.memory_space<vmem>>, %arg7: memref<2x128xf32, #tpu.memory_space<vmem>>) attributes {dimension_semantics = [#tpu.dimension_semantics<parallel>, #tpu.dimension_semantics<parallel>, #tpu.dimension_semantics<arbitrary>], iteration_bounds = array<i64: 1, 2, 2>, scalar_prefetch = 0 : i64, scratch_operands = 1 : i64, tpu.core_type = #tpu.core_type<tc>, window_params = [{transform_indices = @transform_0, window_bounds = array<i64: 2, 256>}, {transform_indices = @transform_1, window_bounds = array<i64: 2, 256>}, {transform_indices = @transform_2, window_bounds = array<i64: 2, 256>}, {transform_indices = @transform_3, window_bounds = array<i64: 1, 1, 8, 128>}]} {
    %c0_i32 = arith.constant 0 : i32
    %0 = arith.cmpi eq, %arg2, %c0_i32 : i32
    %1 = arith.extui %0 : i1 to i32
    %c0_i32_0 = arith.constant 0 : i32
    %2 = arith.cmpi ne, %1, %c0_i32_0 : i32
    scf.if %2 {
      %cst_21 = arith.constant 0.000000e+00 : f32
      %38 = vector.broadcast %cst_21 : f32 to vector<2x128xf32>
      %c0_22 = arith.constant 0 : index
      %c0_23 = arith.constant 0 : index
      %39 = vector.load %arg7[%c0_22, %c0_23] : memref<2x128xf32, #tpu.memory_space<vmem>>, vector<2x128xf32>
      tpu.vector_store %arg7[%c0_22, %c0_23], %38 {strides = array<i32>} : memref<2x128xf32, #tpu.memory_space<vmem>>, vector<2x128xf32>,
    } else {
    }
    %c0 = arith.constant 0 : index
    %c0_1 = arith.constant 0 : index
    %3 = vector.load %arg3[%c0, %c0_1] : memref<2x256xf32, #tpu.memory_space<vmem>>, vector<2x128xf32>
    %cst = arith.constant 9.99999993E-9 : f32
    %4 = vector.broadcast %cst : f32 to vector<2x128xf32>
    %5 = arith.addf %3, %4 : vector<2x128xf32>
    %c0_2 = arith.constant 0 : index
    %c0_3 = arith.constant 0 : index
    %6 = vector.load %arg4[%c0_2, %c0_3] : memref<2x256xf32, #tpu.memory_space<vmem>>, vector<2x128xf32>
    %c0_4 = arith.constant 0 : index
    %c0_5 = arith.constant 0 : index
    %7 = vector.load %arg5[%c0_4, %c0_5] : memref<2x256xf32, #tpu.memory_space<vmem>>, vector<2x128xf32>
    %8 = arith.subf %5, %6 : vector<2x128xf32>
    %cst_6 = arith.constant 0.000000e+00 : f32
    %9 = vector.broadcast %cst_6 : f32 to vector<2x128xf32>
    %10 = arith.subf %9, %7 : vector<2x128xf32>
    %11 = math.exp %10 : vector<2x128xf32>
    %12 = arith.mulf %8, %11 : vector<2x128xf32>
    %13 = arith.mulf %12, %12 : vector<2x128xf32>
    %cst_7 = arith.constant -5.000000e-01 : f32
    %14 = vector.broadcast %cst_7 : f32 to vector<2x128xf32>
    %15 = arith.mulf %14, %13 : vector<2x128xf32>
    %16 = arith.subf %15, %7 : vector<2x128xf32>
    %c0_8 = arith.constant 0 : index
    %c128 = arith.constant 128 : index
    %17 = vector.load %arg3[%c0_8, %c128] : memref<2x256xf32, #tpu.memory_space<vmem>>, vector<2x128xf32>
    %cst_9 = arith.constant 9.99999993E-9 : f32
    %18 = vector.broadcast %cst_9 : f32 to vector<2x128xf32>
    %19 = arith.addf %17, %18 : vector<2x128xf32>
    %c0_10 = arith.constant 0 : index
    %c128_11 = arith.constant 128 : index
    %20 = vector.load %arg4[%c0_10, %c128_11] : memref<2x256xf32, #tpu.memory_space<vmem>>, vector<2x128xf32>
    %c0_12 = arith.constant 0 : index
    %c128_13 = arith.constant 128 : index
    %21 = vector.load %arg5[%c0_12, %c128_13] : memref<2x256xf32, #tpu.memory_space<vmem>>, vector<2x128xf32>
    %22 = arith.subf %19, %20 : vector<2x128xf32>
    %cst_14 = arith.constant 0.000000e+00 : f32
    %23 = vector.broadcast %cst_14 : f32 to vector<2x128xf32>
    %24 = arith.subf %23, %21 : vector<2x128xf32>
    %25 = math.exp %24 : vector<2x128xf32>
    %26 = arith.mulf %22, %25 : vector<2x128xf32>
    %27 = arith.mulf %26, %26 : vector<2x128xf32>
    %cst_15 = arith.constant -5.000000e-01 : f32
    %28 = vector.broadcast %cst_15 : f32 to vector<2x128xf32>
    %29 = arith.mulf %28, %27 : vector<2x128xf32>
    %30 = arith.subf %29, %21 : vector<2x128xf32>
    %31 = arith.addf %16, %30 : vector<2x128xf32>
    %c0_16 = arith.constant 0 : index
    %c0_17 = arith.constant 0 : index
    %32 = vector.load %arg7[%c0_16, %c0_17] : memref<2x128xf32, #tpu.memory_space<vmem>>, vector<2x128xf32>
    %33 = arith.addf %32, %31 : vector<2x128xf32>
    %c0_18 = arith.constant 0 : index
    %c0_19 = arith.constant 0 : index
    %34 = vector.load %arg7[%c0_18, %c0_19] : memref<2x128xf32, #tpu.memory_space<vmem>>, vector<2x128xf32>
    tpu.vector_store %arg7[%c0_18, %c0_19], %33 {strides = array<i32>} : memref<2x128xf32, #tpu.memory_space<vmem>>, vector<2x128xf32>,
    %c1_i32 = arith.constant 1 : i32
    %35 = arith.cmpi eq, %arg2, %c1_i32 : i32
    %36 = arith.extui %35 : i1 to i32
    %c0_i32_20 = arith.constant 0 : i32
    %37 = arith.cmpi ne, %36, %c0_i32_20 : i32
    scf.if %37 {
      %c0_21 = arith.constant 0 : index
      %c0_22 = arith.constant 0 : index
      %38 = vector.load %arg7[%c0_21, %c0_22] : memref<2x128xf32, #tpu.memory_space<vmem>>, vector<2x128xf32>
      %cst_23 = arith.constant dense<0.000000e+00> : vector<2xf32>
      %39 = vector.multi_reduction <add>, %38, %cst_23 [1] : vector<2x128xf32> to vector<2xf32>
      %40 = vector.shape_cast %39 : vector<2xf32> to vector<2x1xf32>
      %cst_24 = arith.constant dense<0.000000e+00> : vector<1xf32>
      %41 = vector.multi_reduction <add>, %40, %cst_24 [0] : vector<2x1xf32> to vector<1xf32>
      %42 = vector.shape_cast %41 : vector<1xf32> to vector<1x1xf32>
      %43 = vector.shape_cast %42 : vector<1x1xf32> to vector<1x1x1x1xf32>
      %44 = vector.shape_cast %43 : vector<1x1x1x1xf32> to vector<1x1x1x1xf32>
      %45 = vector.broadcast %44 : vector<1x1x1x1xf32> to vector<1x1x8x128xf32>
      %c0_25 = arith.constant 0 : index
      %c0_26 = arith.constant 0 : index
      %c0_27 = arith.constant 0 : index
      %c0_28 = arith.constant 0 : index
      %46 = vector.load %arg6[%c0_25, %c0_26, %c0_27, %c0_28] : memref<1x1x8x128xf32, #tpu.memory_space<vmem>>, vector<1x1x8x128xf32>
      tpu.vector_store %arg6[%c0_25, %c0_26, %c0_27, %c0_28], %45 {strides = array<i32>} : memref<1x1x8x128xf32, #tpu.memory_space<vmem>>, vector<1x1x8x128xf32>,
    } else {
    }
    return
  }
  func.func @transform_0(%arg0: i32, %arg1: i32, %arg2: i32) -> (i32, i32) {
    %c2_i32 = arith.constant 2 : i32
    %0 = arith.muli %arg1, %c2_i32 : i32
    %1 = arith.addi %0, %arg2 : i32
    %c0_i32 = arith.constant 0 : i32
    return %arg0, %1 : i32, i32
  }
  func.func @transform_1(%arg0: i32, %arg1: i32, %arg2: i32) -> (i32, i32) {
    %c2_i32 = arith.constant 2 : i32
    %0 = arith.muli %arg1, %c2_i32 : i32
    %1 = arith.addi %0, %arg2 : i32
    %c0_i32 = arith.constant 0 : i32
    return %arg0, %1 : i32, i32
  }
  func.func @transform_2(%arg0: i32, %arg1: i32, %arg2: i32) -> (i32, i32) {
    %c2_i32 = arith.constant 2 : i32
    %0 = arith.muli %arg1, %c2_i32 : i32
    %1 = arith.addi %0, %arg2 : i32
    %c0_i32 = arith.constant 0 : i32
    return %arg0, %1 : i32, i32
  }
  func.func @transform_3(%arg0: i32, %arg1: i32, %arg2: i32) -> (i32, i32, i32, i32) {
    %c0_i32 = arith.constant 0 : i32
    %c0_i32_0 = arith.constant 0 : i32
    %c0_i32_1 = arith.constant 0 : i32
    return %arg0, %arg1, %c0_i32, %c0_i32_0 : i32, i32, i32, i32
  }
}

</mosaic_0001>

<bundles_post_ra>
// kernel: tpu_custom_call.1
= control target key start
LH: loop header
LB: loop body
LE: loop exit
PB: predicated region body
PF: predicated region fallthrough
CT: control target
= control target key end

     0   :  { %s1173_s0 = inlined_call_operand.hbm [shape: f32[2,1024], index: 0, kind: input, shape index: {}]   ;;  %s1174_s1 = inlined_call_operand.hbm [shape: f32[2,1024], index: 1, kind: input, shape index: {}]   ;;  %s1175_s2 = inlined_call_operand.hbm [shape: f32[2,1024], index: 2, kind: input, shape index: {}]   ;;  %s1176_s3 = inlined_call_operand.hbm [shape: f32[1,2,8,128], index: 3, kind: output, shape index: {}]  }
   0x1   :  { %1182 = sst [smem:[#allocation19_spill]] %s1173_s0 }
   0x2   :  { %1183 = sst [smem:[#allocation20_spill]] %s1174_s1 }
   0x3   :  { %8 = vsyncpa [#allocation4], 0 }
   0x4   :  { %10 = vsyncpa [#allocation4 + $0x1], 0 }
   0x5   :  { %11 = vsyncpa [#allocation7], 0 }
   0x6   :  { %13 = vsyncpa [#allocation7 + $0x1], 0 }
   0x7   :  { %14 = vsyncpa [#allocation5], 0 }
   0x8   :  { %16 = vsyncpa [#allocation5 + $0x1], 0  ;;  %s918_s12 = smov 0   ;;  %s920_s13 = smov 0  }
   0x9   :  { %s922_s14 = smov 0   ;;  %s924_s15 = smov 0  }
   0xa   :  { %s926_s16 = smov 0   ;;  %s928_s17 = smov 0  }
   0xb   :  { %s930_s18 = smov 0   ;;  %s932_s19 = smov 0  }
   0xc   :  { %s934_s20 = smov 0   ;;  %s936_s21 = smov 0  }
   0xd   :  { %s938_s22 = smov 0  }
   0xe LB: > { %1184 = sst [smem:[#allocation13_spill]] %s883_s20  ;;  %s972_s23 = sadd.s32 4294967295, %s891_s22   ;;  %s891_s22 = sphi %s938_s22, %s22_s22   ;;  %s887_s21 = sphi %s936_s21, %s1204_s21   ;;  %s883_s20 = sphi %s934_s20, %s1211_s20   ;;  %s879_s19 = sphi %s932_s19, %s1202_s19   ;;  %s875_s18 = sphi %s930_s18, %s1201_s18   ;;  %s871_s17 = sphi %s928_s17, %s1210_s17   ;;  %s867_s16 = sphi %s926_s16, %s1209_s16   ;;  %s863_s15 = sphi %s924_s15, %s1208_s15   ;;  %s859_s14 = sphi %s922_s14, %s1207_s14   ;;  %s855_s13 = sphi %s920_s13, %s1206_s13   ;;  %s851_s12 = sphi %s918_s12, %s1205_s12  }
   0xf   : > { %1185 = sst [smem:[#allocation14_spill]] %s887_s21  ;;  %s531_s24 = sadd.s32 4294967294, %s891_s22  }
  0x10   : > { %s34_s25 = sadd.s32 1, %s883_s20  ;;  %s37_s26 = sadd.s32 1, %s887_s21 }
  0x11   : > { %p35_p0 = scmp.ge.s32.totalorder %s34_s25, 2  ;;  %s532_s27 = sshll.u32 %s887_s21, 1 }
  0x12   : > { %s979_s28 = sadd.s32 %s883_s20, %s532_s27  ;;  %s54_s29 = sadd.s32 1, %s871_s17 }
  0x13   : > { %s1213_s25 = smov (%p35_p0, %s34_s25), 0  ;;  %s1215_s26 = smov (!%p35_p0, %s37_s26), %s887_s21 }
  0x14   : > { %1186 = sst [smem:[#allocation15_spill]] %s1213_s25  ;;  %p61_p1 = scmp.ne.s32.totalorder %s871_s17, %s867_s16 }
  0x15   : > { %p62_p2 = scmp.eq.s32.totalorder %s891_s22, 0  ;;  %p39_p3 = scmp.ge.s32.totalorder %s1215_s26, 2 }
  0x16   : > { %p67_p4 = scmp.ne.s32.totalorder %s867_s16, %s863_s15  ;;  %p68_p6 = scmp.eq.s32.totalorder %s972_s23, 0 }
  0x17   : > { %p989_p5 = por %p62_p2, %p61_p1  ;;  %s1217_s26 = smov (%p39_p3, %s1215_s26), 0 }
  0x18   : > { %1188 = sst [smem:[#allocation16_spill]] %s1217_s26  ;;  %p996_p7 = por %p68_p6, %p67_p4 }
  0x19   : > { %s146_s5 = sadd.s32 1, %s859_s14  ;;  %s533_s6 = sshll.u32 %s1217_s26, 1 }
  0x1a   : > { %s142_s7 = ssub.s32 %s887_s21, %s1217_s26  ;;  %s48_s8 = sadd.s32 %s533_s6, %s1213_s25 }
  0x1b   : > { %p144_p8 = scmp.eq.s32.totalorder %s142_s7, 0  ;;  %s50_s9 = ssub.s32 %s979_s28, %s48_s8 }
  0x1c   : > { %p156_p9 = scmp.ne.s32.totalorder %s859_s14, %s855_s13  ;;  %p52_p10 = scmp.eq.s32.totalorder %s50_s9, 0 }
  0x1d   : > { %p157_p11 = scmp.eq.s32.totalorder %s972_s23, 3  ;;  %p162_p13 = scmp.ne.s32.totalorder %s855_s13, %s851_s12 }
  0x1e   : > { %s1010_s10 = scalar_select %p144_p8, %s859_s14, %s146_s5  }
  0x1f   : > { %s1013_s11 = scalar_select %p52_p10, %s871_s17, %s54_s29  }
  0x20   : > { %1190 = sst [smem:[#allocation17_spill]] %s1010_s10  ;;  %p1015_p12 = por %p157_p11, %p156_p9 }
  0x21   : > { %1191 = sst [smem:[#allocation18_spill]] %s1013_s11  ;;  %p163_p0 = scmp.eq.s32.totalorder %s531_s24, 3 }
  0x22   : > { %p588_p1 = scmp.lt.s32.totalorder %s891_s22, 4  ;;  %s1180_s27 = sand.u32 1, %s871_s17  }
  0x23   : > { %p1025_p2 = por %p163_p0, %p162_p13  ;;  %s1031_s7 = sshll.u32 %s1180_s27, 2 }
  0x24   : > { %s1034_s5 = sshll.u32 %s979_s28, 6  ;;  %p1038_p3 = pnand %p588_p1, %p989_p5 }
  0x25   : > { %s206_s24 = sand.u32 1, %s891_s22   ;;  %s1195_s1 = sld [smem:[#allocation20_spill]] }
  0x26   : > { %s210_s25 = scalar_lea.vmem [#allocation6], %s1031_s7  ;;  %p552_p4 = scmp.ge.s32.totalorder %s891_s22, 1 }
  0x27   : > { %s222_s21 = sshll.u32 %s210_s25, 4  ;;  %s1049_s27 = scalar_lea.sflag [#allocation7], %s206_s24  ;;  %s223_s21 = int_to_ptr.vmem [resolvable:$true] %s222_s21 }
  0x28   : > { %p685_p6 = pneg %p1038_p3  ;;  %s696_s28 = scalar_lea.vmem %s223_s21, 64 }
  0x29   : > { %p697_p5 = scmp.ne.s32.totalorder %s223_s21, %s696_s28  ;;  %s893_s30 = smov [#allocation6]  }
  0x2a   : > { %s701_s20 = sshll.u32 %s893_s30, 4  ;;  %s702_s20 = int_to_ptr.vmem [resolvable:$false] %s701_s20 }
  0x2b   : > { %s220_s26 = scalar_lea.hbm %s1195_s1, %s1034_s5  ;;  %p699_p8 = pnand %p697_p5, %p685_p6 }
  0x2c   : > { %s703_s11 = scalar_lea.vmem %s702_s20, 128  ;;  %p704_p10 = scmp.lt.s32.totalorder %s223_s21, %s702_s20 }
  0x2d   : > { %p700_p9 = pneg %p699_p8  ;;  %p705_p11 = scmp.lt.s32.totalorder %s703_s11, %s696_s28 }
  0x2f   : > { %p706_p13 = por %p705_p11, %p704_p10 }
  0x31   : > { %p707_p0 = pnand %p706_p13, %p700_p9 }
  0x33   : > { %710 = shalt.err (!%p707_p0)
}
  0x34   : > { %580 = dma.hbm_to_vmem [thread:$0]  (!%p1038_p3), %s220_s26, 64, %s223_s21, %s1049_s27  }
  0x35   : > { %p250_p1 = scmp.lt.s32.totalorder %s891_s22, 5  ;;  %s1197_s0 = sld [smem:[#allocation19_spill]] }
  0x36   : > { %s187_s8 = scalar_lea.vmem [#allocation3], %s1031_s7  ;;  %s1198_s28 = sand.u32 1, %s871_s17  }
  0x37   : > { %p1062_p5 = pnand %p552_p4, %p250_p1  ;;  %s199_s9 = sshll.u32 %s187_s8, 4  ;;  %s200_s9 = int_to_ptr.vmem [resolvable:$true] %s199_s9 }
  0x38   : > { %s184_s30 = scalar_lea.sflag [#allocation4], %s1198_s28  ;;  %s724_s1 = scalar_lea.vmem %s200_s9, 64 }
  0x39   : > { %p725_p8 = scmp.ne.s32.totalorder %s200_s9, %s724_s1  ;;  %s894_s21 = smov [#allocation3]  }
  0x3a   : > { %s729_s26 = sshll.u32 %s894_s21, 4  ;;  %s730_s26 = int_to_ptr.vmem [resolvable:$false] %s729_s26 }
  0x3b   : > { %s197_s24 = scalar_lea.hbm %s1197_s0, %s1034_s5  ;;  %p727_p9 = pnand %p725_p8, %p685_p6 }
  0x3c   : > { %s731_s10 = scalar_lea.vmem %s730_s26, 128  ;;  %p732_p4 = scmp.lt.s32.totalorder %s200_s9, %s730_s26 }
  0x3d   : > { %p728_p10 = pneg %p727_p9  ;;  %p733_p11 = scmp.lt.s32.totalorder %s731_s10, %s724_s1 }
  0x3f   : > { %p734_p13 = por %p733_p11, %p732_p4 }
  0x41   : > { %p735_p0 = pnand %p734_p13, %p728_p10 }
  0x43   : > { %738 = shalt.err (!%p735_p0)
}
  0x44   : > { %577 = dma.hbm_to_vmem [thread:$0]  (!%p1038_p3), %s197_s24, 64, %s200_s9, %s184_s30  }
  0x45   : > { %s243_s8 = scalar_lea.hbm %s1175_s2, %s1034_s5  ;;  %s233_s28 = scalar_lea.vmem [#allocation8], %s1031_s7 }
  0x46   : > { %s245_s0 = sshll.u32 %s233_s28, 4  ;;  %s895_s1 = smov [#allocation8]   ;;  %s246_s0 = int_to_ptr.vmem [resolvable:$true] %s245_s0 }
  0x47   : > { %s752_s21 = scalar_lea.vmem %s246_s0, 64  ;;  %s757_s10 = sshll.u32 %s895_s1, 4  ;;  %s758_s10 = int_to_ptr.vmem [resolvable:$false] %s757_s10 }
  0x48   : > { %p753_p1 = scmp.ne.s32.totalorder %s246_s0, %s752_s21  ;;  %s759_s26 = scalar_lea.vmem %s758_s10, 128 }
  0x49   : > { %p760_p10 = scmp.lt.s32.totalorder %s246_s0, %s758_s10  ;;  %p761_p4 = scmp.lt.s32.totalorder %s759_s26, %s752_s21 }
  0x4a   : > { %p755_p8 = pnand %p753_p1, %p685_p6 }
  0x4b   : > { %p762_p11 = por %p761_p4, %p760_p10 }
  0x4c   : > { %p756_p9 = pneg %p755_p8 }
  0x4e   : > { %p763_p13 = pnand %p762_p11, %p756_p9 }
  0x50   : > { %766 = shalt.err (!%p763_p13)
}
  0x51   : > { %583 = dma.hbm_to_vmem [thread:$0]  (!%p1038_p3), %s243_s8, 64, %s246_s0, %s1049_s27  }
  0x52   : > { %254 = sbr.rel (%p1062_p5) target bundleno = 317 (0x13d), region = 32  ;;  %s256_s7 = sand.u32 (!%p1062_p5), 1, %s867_s16  }
  0x53   : > { %s1092_s5 = sshll.u32 (!%p1062_p5), %s256_s7, 2  ;;  %s257_s24 = scalar_lea.sflag (!%p1062_p5), [#allocation4], %s256_s7 }
  0x54   : > { %s260_s9 = scalar_lea.vmem (!%p1062_p5), [#allocation3], %s1092_s5 }
  0x57   : > { %838 = dma.done.wait (%p996_p7), %s257_s24, 64  }
  0x58   : > { %840 = vsyncadd (%p996_p7), %s257_s24, 4294967232  ;;  %s265_s0 = sand.u32 1, %s972_s23   ;;  %s269_s29 = scalar_lea.vmem [#allocation6], %s1092_s5 }
  0x59   : > { %s266_s27 = scalar_lea.sflag [#allocation7], %s265_s0 }
  0x5a   : > { %842 = dma.done.wait (%p996_p7), %s266_s27, 128  }
  0x5b   : > { %844 = vsyncadd (%p996_p7), %s266_s27, 4294967168  ;;  %s308_s25 = sand.u32 1, %s855_s13   ;;  %s278_s20 = scalar_lea.vmem [#allocation8], %s1092_s5 }
  0x5c   : > { %s1108_s30 = sshll.u32 %s308_s25, 3  ;;  %p557_p3 = scmp.ne.s32.totalorder %s875_s18, 0 }
  0x5d   : > { %s310_s11 = scalar_lea.vmem [#allocation9], %s1108_s30 }
  0x5e   : > { %323 = sbr.rel (%p557_p3) target bundleno = 101 (0x65), region = 48 }
  0x63   : > { %v896_v0 = vmov 0.0  }
  0x64   : > { %324 = vst [vmem:[#allocation2] sm:$0x3] %v896_v0 }
  0x65 PF: > { %v328_v1 = vld [vmem:[%s278_s20] sm:$0x3]  ;;  %v340_v3 = vld [vmem:[%s278_s20 + $0x2] sm:$0x3]  ;;  %v325_v7 = vld [vmem:[%s260_s9] sm:$0x3] }
  0x66   : > { %v330_v2 = vsub.f32 0.0, %v328_v1  ;;  %v342_v5 = vsub.f32 0.0, %v340_v3  ;;  %v337_v8 = vld [vmem:[%s260_s9 + $0x2] sm:$0x3]  ;;  %v326_v9 = vadd.f32 1e-08, %v325_v7 }
  0x67   : > { %v327_v10 = vld [vmem:[%s269_s29] sm:$0x3]  ;;  %v338_v11 = vadd.f32 1e-08, %v337_v8  ;;  %v339_v12 = vld [vmem:[%s269_s29 + $0x2] sm:$0x3] }
  0x68   : > { %v331_v4 = vmul.f32 1.442695, %v330_v2  ;;  %v343_v6 = vmul.f32 1.442695, %v342_v5  ;;  %v329_v13 = vsub.f32 %v326_v9, %v327_v10  ;;  %p558_p7 = scmp.ne.s32.totalorder %s875_s18, 1 }
  0x69   : > { %v341_v14 = vsub.f32 %v338_v11, %v339_v12 }
  0x6a   : > { %679 = vpow2.f32 %v331_v4 }
  0x6b   : > { %681 = vpow2.f32 %v343_v6  ;;  %v350_v25 = vld [vmem:[#allocation2] sm:$0x3] }
  0x77   : > { %v680_v15 = vpop.eup %679 }
  0x78   : > { %v333_v16 = vmul.f32 %v680_v15, %v329_v13  ;;  %v682_v17 = vpop.eup %681 }
  0x79   : > { %v345_v19 = vmul.f32 %v682_v17, %v341_v14 }
  0x7a   : > { %v334_v18 = vmul.f32 %v333_v16, %v333_v16 }
  0x7b   : > { %v346_v21 = vmul.f32 %v345_v19, %v345_v19 }
  0x7c   : > { %v335_v20 = vmul.f32 -0.5, %v334_v18 }
  0x7d   : > { %v347_v23 = vmul.f32 -0.5, %v346_v21 }
  0x7e   : > { %v336_v22 = vsub.f32 %v335_v20, %v328_v1 }
  0x7f   : > { %v348_v24 = vsub.f32 %v347_v23, %v340_v3 }
  0x81   : > { %v349_v26 = vadd.f32 %v348_v24, %v336_v22  ;;  %356 = sbr.rel (%p558_p7) target bundleno = 294 (0x126), region = 52 }
  0x83   : > { %v351_v27 = vadd.f32 %v350_v25, %v349_v26 }
  0x85   : > { %352 = vst [vmem:[#allocation2] sm:$0x3] %v351_v27 }
  0x86   : > { %vm358_vm0 = vcmask 1041408  }
  0x8c   : > { %v357_v28 = vld [vmem:[#allocation2] sm:$0x3] }
  0x8d   : > { %v359_v29 = vsel %vm358_vm0, %v357_v28, 0.0 }
  0x8e   : > { %360 = vadd.xlane.f32.xlu0 %v359_v29 }
 0x117   : > { %v361_v30 = vpop.xlane.xlu0 %360 }
 0x118   : > { %v362_v31 = vsel %vm358_vm0, %v361_v30, 0.0 }
 0x119   : > { %v363_v32 = vrot.slane %v362_v31, 4 }
 0x11b   : > { %v364_v33 = vadd.f32 %v363_v32, %v362_v31 }
 0x11d   : > { %v365_v34 = vrot.slane %v364_v33, 2 }
 0x11f   : > { %v366_v35 = vadd.f32 %v365_v34, %v364_v33 }
 0x121   : > { %v367_v36 = vrot.slane %v366_v35, 1 }
 0x123   : > { %v368_v37 = vadd.f32 %v367_v36, %v366_v35 }
 0x125   : > { %369 = vst [vmem:[%s310_s11] sm:$0xff] %v368_v37 }
 0x126 PF: > { %s560_s18 = sshll.u32 %s879_s19, 7  ;;  %s386_s28 = sshll.u32 %s310_s11, 4  ;;  %s387_s28 = int_to_ptr.vmem [resolvable:$true] %s386_s28 }
 0x127   : > { %s384_s8 = scalar_lea.hbm %s1176_s3, %s560_s18  ;;  %s371_s21 = scalar_lea.sflag [#allocation5], %s308_s25 }
 0x128   : > { %s767_s1 = scalar_lea.vmem %s387_s28, 128  ;;  %s897_s10 = smov [#allocation9]  }
 0x129   : > { %p768_p6 = scmp.ne.s32.totalorder %s387_s28, %s767_s1  ;;  %s771_s26 = sshll.u32 %s897_s10, 4  ;;  %s772_s26 = int_to_ptr.vmem [resolvable:$false] %s771_s26 }
 0x12a   : > { %s773_s7 = scalar_lea.vmem %s772_s26, 256  ;;  %p774_p1 = scmp.lt.s32.totalorder %s387_s28, %s772_s26 }
 0x12b   : > { %p769_p5 = pnand %p768_p6, %p1015_p12  ;;  %p775_p8 = scmp.lt.s32.totalorder %s773_s7, %s767_s1 }
 0x12d   : > { %p770_p0 = pneg %p769_p5  ;;  %p776_p9 = por %p775_p8, %p774_p1 }
 0x12f   : > { %p777_p10 = pnand %p776_p9, %p770_p0 }
 0x131   : > { %780 = shalt.err (!%p777_p10)
}
 0x132   : > { %s781_s19 = scalar_lea.hbm %s384_s8, 128  ;;  %s785_s9 = scalar_lea.hbm %s1176_s3, 256 }
 0x133   : > { %p782_p4 = scmp.ne.s32.totalorder %s384_s8, %s781_s19  ;;  %p786_p3 = scmp.lt.s32.totalorder %s384_s8, %s1176_s3 }
 0x134   : > { %p787_p7 = scmp.lt.s32.totalorder %s785_s9, %s781_s19 }
 0x135   : > { %p783_p11 = pnand %p782_p4, %p1015_p12 }
 0x136   : > { %p788_p6 = por %p787_p7, %p786_p3 }
 0x137   : > { %p784_p13 = pneg %p783_p11 }
 0x139   : > { %p789_p5 = pnand %p788_p6, %p784_p13 }
 0x13b   : > { %792 = shalt.err (!%p789_p5)
}
 0x13c   : > { %572 = dma.vmem_to_hbm [thread:$0]  (%p1015_p12), %s387_s28, 128, %s384_s8, %s371_s21  }
 0x13d PF: > { %p589_p0 = scmp.ge.s32.totalorder %s891_s22, 2  ;;  %s398_s29 = sand.u32 1, %s851_s12  }
 0x13e   : > { %s399_s25 = scalar_lea.sflag [#allocation5], %s398_s29 }
 0x13f   : > { %p585_p1 = pnand %p589_p0, %p1025_p2 }
 0x141   : > { %p586_p8 = pneg %p585_p1 }
 0x143   : > { %846 = dma.done.wait (%p586_p8), %s399_s25, 128  }
 0x144   : > { %848 = vsyncadd (%p586_p8), %s399_s25, 4294967168  ;;  %s22_s22 = sadd.s32 1, %s891_s22   ;;  %s1199_s30 = sld [smem:[#allocation17_spill]] }
 0x145   : > { %p19_p9 = scmp.ge.s32.totalorder %s22_s22, 6   ;;  %s1200_s20 = sld [smem:[#allocation18_spill]] }
 0x146   : > { %s1201_s18 = sld [smem:[#allocation13_spill]]  ;;  %s1205_s12 = smov %s855_s13 }
 0x147   : > { %s1202_s19 = sld [smem:[#allocation14_spill]]  ;;  %s1206_s13 = smov %s859_s14 }
 0x148   : > { %s1203_s11 = sld [smem:[#allocation15_spill]]  ;;  %s1208_s15 = smov %s867_s16 }
 0x149   : > { %s1204_s21 = sld [smem:[#allocation16_spill]]  ;;  %s1209_s16 = smov %s871_s17 }
 0x14a   : > { %s1207_s14 = smov %s1199_s30  ;;  %21 = sbr.rel (!%p19_p9) target bundleno = 14 (0xe), region = 109 }
 0x14b   : > { %s1210_s17 = smov %s1200_s20 }
 0x14e   : > { %s1211_s20 = smov %s1203_s11 }
 0x14f   :  { %404 = vsyncpa [#allocation4], 1 }
 0x150   :  { %406 = vsyncpa [#allocation4 + $0x1], 1 }
 0x151   :  { %407 = vsyncpa [#allocation7], 1 }
 0x152   :  { %409 = vsyncpa [#allocation7 + $0x1], 1 }
 0x153   :  { %410 = vsyncpa [#allocation5], 1 }
 0x154   :  { %412 = vsyncpa [#allocation5 + $0x1], 1 }

</bundles_post_ra>
